<compile_context>
chip_gen: v7x
topology: tpu7x:2x2x1
jax: 0.10.0
libtpu: 0.0.40
codegen_flags: <defaults>
</compile_context>

<pallas_src>
import functools

import jax
import jax.numpy as jnp
from jax import lax
from jax.experimental import pallas as pl
from jax.experimental.pallas import tpu as pltpu

EPS = 2e-5  # nn.BatchNorm2d(eps=2e-05); momentum only affects running stats, not the fwd output


# ---------------------------------------------------------------------------
# Host-side helpers
# ---------------------------------------------------------------------------
def _round_up(a, b):
    return (a + b - 1) // b * b


def _vmem_budgets():
    """(per-tile working-set budget, vmem_limit_bytes), sized per TPU generation."""
    try:
        cap = int(pltpu.get_tpu_info().vmem_capacity_bytes)
    except Exception:  # conservative default if the query is unavailable
        cap = 128 * 1024 * 1024
    tile_budget = max(4 * 1024 * 1024, min(cap // 4, 24 * 1024 * 1024))  # ~16 MiB v7x, 24 MiB v5e/v6e
    vmem_limit = max(2 * tile_budget, min(cap // 2, 64 * 1024 * 1024))   # explicit scoped limit
    return int(tile_budget), int(vmem_limit)


def _pick_tile_m(M, K, out_cp, lhs_isz):
    """Largest M tile whose double-buffered working set fits the per-chip budget, >= 2 tiles."""
    tile_budget, vmem_limit = _vmem_budgets()
    row_align = 16 if lhs_isz < 4 else 8                      # bf16 rows pack 2 per sublane
    fixed = 2 * K * out_cp * lhs_isz + 16 * out_cp * 4        # dbl-buffered weight + stats slack
    per_row = 2 * (K * lhs_isz + out_cp * 4)                  # dbl-buffered lhs in + f32 y/out
    tm = (tile_budget - fixed) // max(per_row, 1)
    tm = max(row_align, min(int(tm), 8192))
    # Keep at least two grid steps so the ("parallel",) axis can split across v7x's two TCs.
    tm = min(tm, _round_up(-(-M // 2), row_align))
    tm -= tm % row_align
    return max(row_align, int(tm)), vmem_limit


def _im2col_nhwc(x_nchw, kh, kw, stride, padding):
    """NCHW -> (M, K) patches, M=N*Ho*Wo, K ordered (tap, channel). 1x1 is a pure reshape.

    TODO(synk): implicit GEMM for kh,kw>1 to avoid the kh*kw HBM inflation of the patches array.
    """
    N, C, H, W = x_nchw.shape
    sh, sw = stride
    ph, pw = padding
    x = jnp.transpose(x_nchw, (0, 2, 3, 1))                    # NHWC: channels on lanes
    xp = jnp.pad(x, ((0, 0), (ph, ph), (pw, pw), (0, 0)))
    Ho = (H + 2 * ph - kh) // sh + 1
    Wo = (W + 2 * pw - kw) // sw + 1
    if kh == 1 and kw == 1:
        patches = xp[:, ::sh, ::sw, :]
        return patches.reshape(N * Ho * Wo, C), Ho, Wo
    cols = []
    for i in range(kh):
        for j in range(kw):
            cols.append(xp[:, i:i + sh * Ho:sh, j:j + sw * Wo:sw, :])
    patches = jnp.stack(cols, axis=3)                          # (N, Ho, Wo, taps, C)
    return patches.reshape(N * Ho * Wo, kh * kw * C), Ho, Wo


def _block_diag_weight(weight, groups, kh, kw, out_cp):
    """PyTorch (out_c, cg_in, kh, kw) -> (K, out_cp) block-diagonal over groups, K=(kh*kw)*C.

    TODO(synk): for large group counts / depthwise GDC use a grouped contraction instead of
                paying MXU FLOPs and VMEM for the zero off-diagonal blocks.
    """
    out_c, cg_in = weight.shape[0], weight.shape[1]
    cg_out = out_c // groups
    taps = kh * kw
    w = jnp.transpose(weight, (2, 3, 1, 0)).reshape(taps, cg_in, groups, cg_out)
    eye = jnp.eye(groups, dtype=weight.dtype)
    w_full = jnp.einsum('tcgo,hg->thcgo', w, eye).reshape(taps * groups * cg_in, out_c)
    if out_cp != out_c:
        w_full = jnp.pad(w_full, ((0, 0), (0, out_cp - out_c)))
    return w_full


# ---------------------------------------------------------------------------
# Public API
# ---------------------------------------------------------------------------
def gdc_block(x, weight, gamma, beta, *, kernel=(1, 1), stride=(1, 1),
              padding=(0, 0), groups=1, compute_dtype=None, out_layout="NCHW"):
    """Conv2d(bias=False, groups) + BatchNorm2d (training-mode batch stats, eps=2e-5).

    x: (N, C, H, W) NCHW; weight: (out_c, C//groups, kh, kw) OIHW (PyTorch conventions).
    compute_dtype: optional MXU operand dtype (e.g. jnp.bfloat16, fine on v5e/v6e/v7x);
      accumulation and all BN math stay f32.
    out_layout: "NCHW" (default, PyTorch-compatible) or "NHWC" to skip the final relayout.
    """
    N, C, H, W = x.shape
    out_c = weight.shape[0]
    kh, kw = kernel

    # Lane-dense output channels: pad out_c to a 128 multiple only when the inflation is small.
    pad128 = _round_up(out_c, 128)
    out_cp = pad128 if (out_c >= 64 and pad128 - out_c <= out_c // 4) else out_c

    # Cast *before* building patches so any im2col materialization is already narrow.
    if compute_dtype is not None:
        x_c = x.astype(compute_dtype)
        w_c = weight.astype(compute_dtype)
    else:
        x_c, w_c = x, weight

    lhs, Ho, Wo = _im2col_nhwc(x_c, kh, kw, stride, padding)    # (M, K), K = kh*kw*C
    M, K = lhs.shape
    w_full = _block_diag_weight(w_c, groups, kh, kw, out_cp)    # (K, out_cp)

    lhs_isz = lhs.dtype.itemsize
    out_dtype = x.dtype
    TM, vmem_limit = _pick_tile_m(M, K, out_cp, lhs_isz)
    num_tiles = -(-M // TM)
    Mp = num_tiles * TM    # outputs are allocated Mp rows; the lhs tail is masked in-kernel

    cparams = pltpu.CompilerParams(dimension_semantics=("parallel",),
                                   vmem_limit_bytes=vmem_limit)

    lhs_spec = pl.BlockSpec((TM, K), lambda t: (t, 0))
    w_spec = pl.BlockSpec((K, out_cp), lambda t: (0, 0))
    row_spec = pl.BlockSpec((TM, out_cp), lambda t: (t, 0))
    vec_spec = pl.BlockSpec((1, 1, out_cp), lambda t: (t, 0, 0))
    affine_spec = pl.BlockSpec((2, out_cp), lambda t: (0, 0))

    # Fused conv+BN in pass 2 (re-reading lhs) beats writing + re-reading a f32 y whenever the
    # per-row lhs bytes are below the y round-trip bytes (typical for 1x1 convs).
    fuse_recompute = K * lhs_isz < 2 * 4 * out_cp

    def _tile_stats(y, t):
        # Mask the garbage rows of the last (partial) tile: OOB block reads are undefined and
        # must not leak into the batch statistics.
        rows = lax.broadcasted_iota(jnp.int32, (TM, 1), 0) + t * TM
        valid = rows < M
        y_m = jnp.where(valid, y, 0.0)
        s = jnp.sum(y_m, axis=0, keepdims=True)                            # (1, out_cp)
        n = jnp.maximum(jnp.minimum(M - t * TM, TM), 1).astype(jnp.float32)
        c = s / n                                                          # tile-local shift
        d = jnp.where(valid, y - c, 0.0)
        q = jnp.sum(d * d, axis=0, keepdims=True)                          # centered sum of squares
        return s, q, c

    def conv_stats_y_kernel(lhs_ref, w_ref, y_ref, s_ref, q_ref, c_ref):
        y = jnp.dot(lhs_ref[...], w_ref[...], preferred_element_type=jnp.float32)
        y_ref[...] = y
        s, q, c = _tile_stats(y, pl.program_id(0))
        s_ref[0] = s
        q_ref[0] = q
        c_ref[0] = c

    def conv_stats_kernel(lhs_ref, w_ref, s_ref, q_ref, c_ref):
        y = jnp.dot(lhs_ref[...], w_ref[...], preferred_element_type=jnp.float32)
        s, q, c = _tile_stats(y, pl.program_id(0))
        s_ref[0] = s
        q_ref[0] = q
        c_ref[0] = c

    stat_shape = jax.ShapeDtypeStruct((num_tiles, 1, out_cp), jnp.float32)

    if fuse_recompute:
        cost1 = pl.CostEstimate(
            flops=2 * Mp * K * out_cp, transcendentals=0,
            bytes_accessed=M * K * lhs_isz + K * out_cp * lhs_isz + 3 * num_tiles * out_cp * 4)
        tile_sum, tile_css, tile_shift = pl.pallas_call(
            conv_stats_kernel,
            out_shape=(stat_shape, stat_shape, stat_shape),
            grid=(num_tiles,),
            in_specs=[lhs_spec, w_spec],
            out_specs=(vec_spec, vec_spec, vec_spec),
            compiler_params=cparams, cost_estimate=cost1,
        )(lhs, w_full)
        y = None
    else:
        cost1 = pl.CostEstimate(
            flops=2 * Mp * K * out_cp, transcendentals=0,
            bytes_accessed=(M * K * lhs_isz + K * out_cp * lhs_isz
                            + Mp * out_cp * 4 + 3 * num_tiles * out_cp * 4))
        y, tile_sum, tile_css, tile_shift = pl.pallas_call(
            conv_stats_y_kernel,
            out_shape=(jax.ShapeDtypeStruct((Mp, out_cp), jnp.float32),
                       stat_shape, stat_shape, stat_shape),
            grid=(num_tiles,),
            in_specs=[lhs_spec, w_spec],
            out_specs=(row_spec, vec_spec, vec_spec, vec_spec),
            compiler_params=cparams, cost_estimate=cost1,
        )(lhs, w_full)

    # Tiny cross-tile reduction + BN folding (all f32, negligible next to the conv).
    n_t = jnp.minimum(TM, M - jnp.arange(num_tiles) * TM).astype(jnp.float32)[:, None]
    s_t = tile_sum[:, 0, :]
    q_t = tile_css[:, 0, :]
    c_t = tile_shift[:, 0, :]
    mean = jnp.sum(s_t, axis=0) / M
    # Chan-style combine of tile-centered second moments (avoids E[y^2]-E[y]^2 cancellation).
    cross = 2.0 * (c_t - mean) * (s_t - n_t * c_t) + n_t * (c_t - mean) ** 2
    var = jnp.maximum(jnp.sum(q_t + cross, axis=0) / M, 0.0)     # biased (training-mode) variance

    scale = gamma.astype(jnp.float32) * lax.rsqrt(var[:out_c] + EPS)
    shift = beta.astype(jnp.float32) - mean[:out_c] * scale
    if out_cp != out_c:  # padded channels get identically-zero scale/shift
        scale = jnp.pad(scale, (0, out_cp - out_c))
        shift = jnp.pad(shift, (0, out_cp - out_c))
    affine = jnp.stack([scale, shift], axis=0)                   # (2, out_cp) f32

    if fuse_recompute:
        def conv_bn_kernel(lhs_ref, w_ref, affine_ref, out_ref):
            y2 = jnp.dot(lhs_ref[...], w_ref[...], preferred_element_type=jnp.float32)
            out_ref[...] = (y2 * affine_ref[0:1, :] + affine_ref[1:2, :]).astype(out_ref.dtype)

        cost2 = pl.CostEstimate(
            flops=2 * Mp * K * out_cp, transcendentals=0,
            bytes_accessed=(M * K * lhs_isz + K * out_cp * lhs_isz + 2 * out_cp * 4
                            + Mp * out_cp * out_dtype.itemsize))
        out = pl.pallas_call(
            conv_bn_kernel,
            out_shape=jax.ShapeDtypeStruct((Mp, out_cp), out_dtype),
            grid=(num_tiles,),
            in_specs=[lhs_spec, w_spec, affine_spec],
            out_specs=row_spec,
            compiler_params=cparams, cost_estimate=cost2,
        )(lhs, w_full, affine)
    else:
        def bn_apply_kernel(y_ref, affine_ref, out_ref):
            out_ref[...] = (y_ref[...] * affine_ref[0:1, :]
                            + affine_ref[1:2, :]).astype(out_ref.dtype)

        cost2 = pl.CostEstimate(
            flops=2 * Mp * out_cp, transcendentals=0,
            bytes_accessed=Mp * out_cp * (4 + out_dtype.itemsize) + 2 * out_cp * 4)
        alias = {0: 0} if out_dtype == jnp.float32 else {}       # write out in place of y
        out = pl.pallas_call(
            bn_apply_kernel,
            out_shape=jax.ShapeDtypeStruct((Mp, out_cp), out_dtype),
            grid=(num_tiles,),
            in_specs=[row_spec, affine_spec],
            out_specs=row_spec,
            compiler_params=cparams, cost_estimate=cost2,
            input_output_aliases=alias,
        )(y, affine)

    out = out[:M, :out_c].reshape(N, Ho, Wo, out_c)              # group-merged PyTorch channel order
    if out_layout == "NHWC":
        return out
    # TODO(synk): fuse this NHWC->NCHW relayout into the pass-2 store when NCHW is required.
    return jnp.transpose(out, (0, 3, 1, 2))


def gdc_block_ref(x, weight, gamma, beta, *, stride, padding, groups):
    """Plain-JAX reference: lax conv + training-mode batch norm."""
    y = jax.lax.conv_general_dilated(
        x, weight, window_strides=stride,
        padding=[(padding[0], padding[0]), (padding[1], padding[1])],
        dimension_numbers=("NCHW", "OIHW", "NCHW"),
        feature_group_count=groups)
    mean = jnp.mean(y, axis=(0, 2, 3), keepdims=True)
    var = jnp.mean((y - mean) ** 2, axis=(0, 2, 3), keepdims=True)
    return ((y - mean) * jax.lax.rsqrt(var + EPS)
            * gamma.reshape(1, -1, 1, 1) + beta.reshape(1, -1, 1, 1))


if __name__ == "__main__":
    key = jax.random.PRNGKey(0)
    k_x, k_w, k_g, k_b, k_w2, k_x3, k_w3, k_g3, k_b3 = jax.random.split(key, 9)

    # Case 1: grouped 3x3, stride 2, padding 1; M % TM != 0 (store-y path + in-kernel tail mask).
    N, in_c, H, W = 2, 4, 13, 13
    out_c, kern, stride, padding, groups = 8, (3, 3), (2, 2), (1, 1), 2

    x = jax.random.normal(k_x, (N, in_c, H, W), dtype=jnp.float32)
    w = jax.random.normal(k_w, (out_c, in_c // groups, kern[0], kern[1]), dtype=jnp.float32) * 0.1
    gamma = 1.0 + 0.1 * jax.random.normal(k_g, (out_c,), dtype=jnp.float32)
    beta = 0.1 * jax.random.normal(k_b, (out_c,), dtype=jnp.float32)

    f1 = jax.jit(functools.partial(gdc_block, kernel=kern, stride=stride,
                                   padding=padding, groups=groups))
    y1 = jax.block_until_ready(f1(x, w, gamma, beta))
    y1_ref = gdc_block_ref(x, w, gamma, beta, stride=stride, padding=padding, groups=groups)
    assert y1.shape == (N, out_c, 7, 7), y1.shape
    assert jnp.allclose(y1, y1_ref, atol=1e-3, rtol=1e-3), float(jnp.max(jnp.abs(y1 - y1_ref)))

    # Case 1b: bf16 MXU operands (allowed on v5e/v6e/v7x), f32 accumulation + f32 BN math.
    f1b = jax.jit(functools.partial(gdc_block, kernel=kern, stride=stride, padding=padding,
                                    groups=groups, compute_dtype=jnp.bfloat16))
    y1b = jax.block_until_ready(f1b(x, w, gamma, beta))
    assert jnp.allclose(y1b, y1_ref, atol=1e-1, rtol=1e-1), float(jnp.max(jnp.abs(y1b - y1_ref)))

    # Case 2: 1x1 pointwise conv (pure-reshape lhs, fused conv+BN recompute path, no y in HBM).
    w1x1 = jax.random.normal(k_w2, (out_c, in_c, 1, 1), dtype=jnp.float32) * 0.1
    f2 = jax.jit(functools.partial(gdc_block, kernel=(1, 1), stride=(1, 1),
                                   padding=(0, 0), groups=1))
    y2 = jax.block_until_ready(f2(x, w1x1, gamma, beta))
    y2_ref = gdc_block_ref(x, w1x1, gamma, beta, stride=(1, 1), padding=(0, 0), groups=1)
    assert y2.shape == (N, out_c, H, W), y2.shape
    assert jnp.allclose(y2, y2_ref, atol=1e-3, rtol=1e-3), float(jnp.max(jnp.abs(y2 - y2_ref)))

    # Case 3: 1x1 with out_c=112 -> padded to 128 lanes (lane-dense stores) + tail masking.
    N3, c3, s3, oc3 = 2, 8, 9, 112
    x3 = jax.random.normal(k_x3, (N3, c3, s3, s3), dtype=jnp.float32)
    w3 = jax.random.normal(k_w3, (oc3, c3, 1, 1), dtype=jnp.float32) * 0.1
    g3 = 1.0 + 0.1 * jax.random.normal(k_g3, (oc3,), dtype=jnp.float32)
    b3 = 0.1 * jax.random.normal(k_b3, (oc3,), dtype=jnp.float32)
    f3 = jax.jit(functools.partial(gdc_block, kernel=(1, 1), stride=(1, 1),
                                   padding=(0, 0), groups=1))
    y3 = jax.block_until_ready(f3(x3, w3, g3, b3))
    y3_ref = gdc_block_ref(x3, w3, g3, b3, stride=(1, 1), padding=(0, 0), groups=1)
    assert y3.shape == (N3, oc3, s3, s3), y3.shape
    assert jnp.allclose(y3, y3_ref, atol=1e-3, rtol=1e-3), float(jnp.max(jnp.abs(y3 - y3_ref)))

    print("KERNEL_OK")
</pallas_src>

<mosaic_0001>
module attributes {stable_mosaic.version = 11 : i64} {
  func.func @conv_stats_y_kernel(%arg0: i32, %arg1: memref<56x36xf32, #tpu.memory_space<vmem>>, %arg2: memref<36x8xf32, #tpu.memory_space<vmem>>, %arg3: memref<56x8xf32, #tpu.memory_space<vmem>>, %arg4: memref<1x1x8xf32, #tpu.memory_space<vmem>>, %arg5: memref<1x1x8xf32, #tpu.memory_space<vmem>>, %arg6: memref<1x1x8xf32, #tpu.memory_space<vmem>>) attributes {dimension_semantics = [#tpu.dimension_semantics<parallel>], iteration_bounds = array<i64: 2>, scalar_prefetch = 0 : i64, scratch_operands = 0 : i64, tpu.core_type = #tpu.core_type<tc>, window_params = [{transform_indices = @transform_0, window_bounds = array<i64: 56, 36>}, {pipeline_mode = #tpu.pipeline_mode<synchronous>, transform_indices = @transform_1, window_bounds = array<i64: 36, 8>}, {transform_indices = @transform_2, window_bounds = array<i64: 56, 8>}, {transform_indices = @transform_3, window_bounds = array<i64: 1, 1, 8>}, {transform_indices = @transform_4, window_bounds = array<i64: 1, 1, 8>}, {transform_indices = @transform_5, window_bounds = array<i64: 1, 1, 8>}]} {
    %c0 = arith.constant 0 : index
    %c0_0 = arith.constant 0 : index
    %0 = vector.load %arg1[%c0, %c0_0] : memref<56x36xf32, #tpu.memory_space<vmem>>, vector<56x36xf32>
    %c0_1 = arith.constant 0 : index
    %c0_2 = arith.constant 0 : index
    %1 = vector.load %arg2[%c0_1, %c0_2] : memref<36x8xf32, #tpu.memory_space<vmem>>, vector<36x8xf32>
    %cst = arith.constant dense<0.000000e+00> : vector<56x8xf32>
    %2 = tpu.matmul %0, %1, %cst {dimension_numbers = #tpu.dot_dimension_numbers<[1], [0], [0], [1], [0, 0, 1, 1], [], []>} : vector<56x36xf32>, vector<36x8xf32>, vector<56x8xf32> -> vector<56x8xf32>
    %c0_3 = arith.constant 0 : index
    %c0_4 = arith.constant 0 : index
    %3 = vector.load %arg3[%c0_3, %c0_4] : memref<56x8xf32, #tpu.memory_space<vmem>>, vector<56x8xf32>
    tpu.vector_store %arg3[%c0_3, %c0_4], %2 {strides = array<i32>} : memref<56x8xf32, #tpu.memory_space<vmem>>, vector<56x8xf32>,
    %4 = tpu.iota {dimensions = array<i32: 0>} : vector<56x1xi32>
    %c56_i32 = arith.constant 56 : i32
    %5 = arith.muli %arg0, %c56_i32 : i32
    %6 = vector.broadcast %5 : i32 to vector<56x1xi32>
    %7 = arith.addi %4, %6 : vector<56x1xi32>
    %c98_i32 = arith.constant 98 : i32
    %8 = vector.broadcast %c98_i32 : i32 to vector<56x1xi32>
    %9 = arith.cmpi slt, %7, %8 : vector<56x1xi32>
    %cst_5 = arith.constant 0.000000e+00 : f32
    %10 = vector.shape_cast %9 : vector<56x1xi1> to vector<56x1xi1>
    %11 = vector.broadcast %10 : vector<56x1xi1> to vector<56x8xi1>
    %12 = vector.broadcast %cst_5 : f32 to vector<56x8xf32>
    %13 = arith.select %11, %2, %12 : vector<56x8xi1>, vector<56x8xf32>
    %cst_6 = arith.constant dense<0.000000e+00> : vector<8xf32>
    %14 = vector.multi_reduction <add>, %13, %cst_6 [0] : vector<56x8xf32> to vector<8xf32>
    %15 = vector.shape_cast %14 : vector<8xf32> to vector<1x8xf32>
    %c56_i32_7 = arith.constant 56 : i32
    %16 = arith.muli %arg0, %c56_i32_7 : i32
    %c98_i32_8 = arith.constant 98 : i32
    %17 = arith.subi %c98_i32_8, %16 : i32
    %c56_i32_9 = arith.constant 56 : i32
    %18 = arith.minsi %17, %c56_i32_9 : i32
    %c1_i32 = arith.constant 1 : i32
    %19 = arith.maxsi %18, %c1_i32 : i32
    %20 = arith.sitofp %19 : i32 to f32
    %21 = vector.broadcast %20 : f32 to vector<1x8xf32>
    %22 = arith.divf %15, %21 : vector<1x8xf32>
    %23 = vector.broadcast %22 : vector<1x8xf32> to vector<56x8xf32>
    %24 = arith.subf %2, %23 : vector<56x8xf32>
    %cst_10 = arith.constant 0.000000e+00 : f32
    %25 = vector.shape_cast %9 : vector<56x1xi1> to vector<56x1xi1>
    %26 = vector.broadcast %25 : vector<56x1xi1> to vector<56x8xi1>
    %27 = vector.broadcast %cst_10 : f32 to vector<56x8xf32>
    %28 = arith.select %26, %24, %27 : vector<56x8xi1>, vector<56x8xf32>
    %29 = arith.mulf %28, %28 : vector<56x8xf32>
    %cst_11 = arith.constant dense<0.000000e+00> : vector<8xf32>
    %30 = vector.multi_reduction <add>, %29, %cst_11 [0] : vector<56x8xf32> to vector<8xf32>
    %31 = vector.shape_cast %30 : vector<8xf32> to vector<1x8xf32>
    %c0_12 = arith.constant 0 : index
    %c0_13 = arith.constant 0 : index
    %c0_14 = arith.constant 0 : index
    %32 = vector.load %arg4[%c0_12, %c0_13, %c0_14] : memref<1x1x8xf32, #tpu.memory_space<vmem>>, vector<1x1x8xf32>
    %33 = vector.shape_cast %32 : vector<1x1x8xf32> to vector<1x8xf32>
    %34 = vector.shape_cast %15 : vector<1x8xf32> to vector<1x1x8xf32>
    tpu.vector_store %arg4[%c0_12, %c0_13, %c0_14], %34 {strides = array<i32>} : memref<1x1x8xf32, #tpu.memory_space<vmem>>, vector<1x1x8xf32>,
    %c0_15 = arith.constant 0 : index
    %c0_16 = arith.constant 0 : index
    %c0_17 = arith.constant 0 : index
    %35 = vector.load %arg5[%c0_15, %c0_16, %c0_17] : memref<1x1x8xf32, #tpu.memory_space<vmem>>, vector<1x1x8xf32>
    %36 = vector.shape_cast %35 : vector<1x1x8xf32> to vector<1x8xf32>
    %37 = vector.shape_cast %31 : vector<1x8xf32> to vector<1x1x8xf32>
    tpu.vector_store %arg5[%c0_15, %c0_16, %c0_17], %37 {strides = array<i32>} : memref<1x1x8xf32, #tpu.memory_space<vmem>>, vector<1x1x8xf32>,
    %c0_18 = arith.constant 0 : index
    %c0_19 = arith.constant 0 : index
    %c0_20 = arith.constant 0 : index
    %38 = vector.load %arg6[%c0_18, %c0_19, %c0_20] : memref<1x1x8xf32, #tpu.memory_space<vmem>>, vector<1x1x8xf32>
    %39 = vector.shape_cast %38 : vector<1x1x8xf32> to vector<1x8xf32>
    %40 = vector.shape_cast %22 : vector<1x8xf32> to vector<1x1x8xf32>
    tpu.vector_store %arg6[%c0_18, %c0_19, %c0_20], %40 {strides = array<i32>} : memref<1x1x8xf32, #tpu.memory_space<vmem>>, vector<1x1x8xf32>,
    return
  }
  func.func @transform_0(%arg0: i32) -> (i32, i32) {
    %c0_i32 = arith.constant 0 : i32
    %c0_i32_0 = arith.constant 0 : i32
    return %arg0, %c0_i32 : i32, i32
  }
  func.func @transform_1(%arg0: i32) -> (i32, i32) {
    %c0_i32 = arith.constant 0 : i32
    %c0_i32_0 = arith.constant 0 : i32
    %c0_i32_1 = arith.constant 0 : i32
    return %c0_i32, %c0_i32_0 : i32, i32
  }
  func.func @transform_2(%arg0: i32) -> (i32, i32) {
    %c0_i32 = arith.constant 0 : i32
    %c0_i32_0 = arith.constant 0 : i32
    return %arg0, %c0_i32 : i32, i32
  }
  func.func @transform_3(%arg0: i32) -> (i32, i32, i32) {
    %c0_i32 = arith.constant 0 : i32
    %c0_i32_0 = arith.constant 0 : i32
    %c0_i32_1 = arith.constant 0 : i32
    return %arg0, %c0_i32, %c0_i32_0 : i32, i32, i32
  }
  func.func @transform_4(%arg0: i32) -> (i32, i32, i32) {
    %c0_i32 = arith.constant 0 : i32
    %c0_i32_0 = arith.constant 0 : i32
    %c0_i32_1 = arith.constant 0 : i32
    return %arg0, %c0_i32, %c0_i32_0 : i32, i32, i32
  }
  func.func @transform_5(%arg0: i32) -> (i32, i32, i32) {
    %c0_i32 = arith.constant 0 : i32
    %c0_i32_0 = arith.constant 0 : i32
    %c0_i32_1 = arith.constant 0 : i32
    return %arg0, %c0_i32, %c0_i32_0 : i32, i32, i32
  }
}

module attributes {stable_mosaic.version = 11 : i64} {
  func.func @bn_apply_kernel(%arg0: i32, %arg1: memref<56x8xf32, #tpu.memory_space<vmem>>, %arg2: memref<2x8xf32, #tpu.memory_space<vmem>>, %arg3: memref<56x8xf32, #tpu.memory_space<vmem>>) attributes {dimension_semantics = [#tpu.dimension_semantics<parallel>], iteration_bounds = array<i64: 2>, scalar_prefetch = 0 : i64, scratch_operands = 0 : i64, tpu.core_type = #tpu.core_type<tc>, window_params = [{transform_indices = @transform_0, window_bounds = array<i64: 56, 8>}, {pipeline_mode = #tpu.pipeline_mode<synchronous>, transform_indices = @transform_1, window_bounds = array<i64: 2, 8>}, {transform_indices = @transform_2, window_bounds = array<i64: 56, 8>}]} {
    %c0 = arith.constant 0 : index
    %c0_0 = arith.constant 0 : index
    %0 = vector.load %arg1[%c0, %c0_0] : memref<56x8xf32, #tpu.memory_space<vmem>>, vector<56x8xf32>
    %c0_1 = arith.constant 0 : index
    %c0_2 = arith.constant 0 : index
    %1 = vector.load %arg2[%c0_1, %c0_2] : memref<2x8xf32, #tpu.memory_space<vmem>>, vector<1x8xf32>
    %2 = vector.broadcast %1 : vector<1x8xf32> to vector<56x8xf32>
    %3 = arith.mulf %0, %2 : vector<56x8xf32>
    %c1 = arith.constant 1 : index
    %c0_3 = arith.constant 0 : index
    %4 = vector.load %arg2[%c1, %c0_3] : memref<2x8xf32, #tpu.memory_space<vmem>>, vector<1x8xf32>
    %5 = vector.broadcast %4 : vector<1x8xf32> to vector<56x8xf32>
    %6 = arith.addf %3, %5 : vector<56x8xf32>
    %c0_4 = arith.constant 0 : index
    %c0_5 = arith.constant 0 : index
    %7 = vector.load %arg3[%c0_4, %c0_5] : memref<56x8xf32, #tpu.memory_space<vmem>>, vector<56x8xf32>
    tpu.vector_store %arg3[%c0_4, %c0_5], %6 {strides = array<i32>} : memref<56x8xf32, #tpu.memory_space<vmem>>, vector<56x8xf32>,
    return
  }
  func.func @transform_0(%arg0: i32) -> (i32, i32) {
    %c0_i32 = arith.constant 0 : i32
    %c0_i32_0 = arith.constant 0 : i32
    return %arg0, %c0_i32 : i32, i32
  }
  func.func @transform_1(%arg0: i32) -> (i32, i32) {
    %c0_i32 = arith.constant 0 : i32
    %c0_i32_0 = arith.constant 0 : i32
    %c0_i32_1 = arith.constant 0 : i32
    return %c0_i32, %c0_i32_0 : i32, i32
  }
  func.func @transform_2(%arg0: i32) -> (i32, i32) {
    %c0_i32 = arith.constant 0 : i32
    %c0_i32_0 = arith.constant 0 : i32
    return %arg0, %c0_i32 : i32, i32
  }
}

</mosaic_0001>

<bundles_post_ra>
// kernel: gdc_block.3
= control target key start
LH: loop header
LB: loop body
LE: loop exit
PB: predicated region body
PF: predicated region fallthrough
CT: control target
= control target key end

     0   :  { %7 = vsyncpa [#allocation3], 0  ;;  %s757_s0 = inlined_call_operand.hbm [shape: f32[112,8], index: 0, kind: input, shape index: {}, may-alias: {0,2}]   ;;  %s758_s1 = inlined_call_operand.hbm [shape: f32[2,8], index: 1, kind: input, shape index: {}]   ;;  %s759_s2 = inlined_call_operand.hbm [shape: f32[112,8], index: 2, kind: output, shape index: {}, may-alias: {0,2}]  }
   0x1   :  { %9 = vsyncpa [#allocation3 + $0x1], 0 }
   0x2   :  { %10 = vsyncpa [#allocation6], 0 }
   0x3   :  { %11 = vsyncpa [#allocation4], 0 }
   0x4   :  { %13 = vsyncpa [#allocation4 + $0x1], 0  ;;  %s542_s9 = smov 0   ;;  %s544_s10 = smov 0  }
   0x5   :  { %s546_s11 = smov 0   ;;  %s548_s12 = smov 0  }
   0x6 LB: > { %s563_s13 = sadd.s32 4294967295, %s518_s12   ;;  %s313_s14 = sadd.s32 4294967294, %s518_s12   ;;  %s518_s12 = sphi %s548_s12, %s784_s12   ;;  %s514_s11 = sphi %s546_s11, %s783_s11   ;;  %s510_s10 = sphi %s544_s10, %s782_s10   ;;  %s506_s9 = sphi %s542_s9, %s781_s9  }
   0x7   : > { %s567_s15 = sadd.s32 1, %s518_s12   ;;  %s26_s16 = sadd.s32 1, %s514_s11 }
   0x8   : > { %s23_s17 = ssub.s32 %s518_s12, %s567_s15  ;;  %p33_p0 = scmp.ne.s32.totalorder %s514_s11, %s510_s10 }
   0x9   : > { %p24_p1 = scmp.eq.s32.totalorder %s23_s17, 0  ;;  %p34_p2 = scmp.eq.s32.totalorder %s518_s12, 0 }
   0xa   : > { %p39_p3 = scmp.ne.s32.totalorder %s510_s10, %s506_s9  ;;  %p760_p4 = scmp.eq.s32.totalorder %s563_s13, 0 }
   0xb   : > { %s579_s18 = scalar_select %p24_p1, %s514_s11, %s26_s16  }
   0xc   : > { %p581_p5 = por %p34_p2, %p33_p0  ;;  %p587_p6 = por %p760_p4, %p39_p3 }
   0xd   : > { %p84_p7 = scmp.eq.s32.totalorder %s563_s13, 1  ;;  %p90_p8 = scmp.eq.s32.totalorder %s313_s14, 1 }
   0xe   : > { %s766_s20 = scalar_select %p587_p6, 1, 0 }
   0xf   : > { %p314_p9 = scmp.ge.s32.totalorder %s518_s12, 1  ;;  %p97_p10 = scmp.lt.s32.totalorder %s518_s12, 3 }
  0x10   : > { %p594_p11 = por %p84_p7, %p33_p0  ;;  %p598_p12 = por %p90_p8, %p39_p3 }
  0x11   : > { %p602_p13 = pnand %p314_p9, %p97_p10  ;;  %s520_s24 = smov [#allocation5]  }
  0x12   : > { %s767_s21 = scalar_select %p594_p11, 1, 0 }
  0x13   : > { %s768_s22 = scalar_select %p598_p12, 1, 0 }
  0x14   : > { %s769_s23 = scalar_select %p602_p13, 1, 0 }
  0x15   : > { %p337_p2 = pneg %p602_p13  ;;  %s110_s25 = sshll.u32 %s520_s24, 4  ;;  %s111_s25 = int_to_ptr.vmem [resolvable:$true] %s110_s25 }
  0x16   : > { %p350_p4 = scmp.lt.s32.totalorder %s518_s12, 2  ;;  %p770_p0 = scmp.eq.s32.totalorder %s563_s13, 0 }
  0x17   : > { %s121_s27 = sand.u32 1, %s514_s11   ;;  %s390_s4 = scalar_lea.hbm %s758_s1, 32 }
  0x18   : > { %p612_p7 = pnand %p337_p2, %p770_p0  ;;  %p619_p3 = pnand %p350_p4, %p581_p5 }
  0x19   : > { %s327_s29 = smul.u32 56, %s121_s27  ;;  %p391_p8 = scmp.ne.s32.totalorder %s758_s1, %s390_s4 }
  0x1a   : > { %s772_s28 = scalar_select %p619_p3, 1, 0 }
  0x1b   : > { %p392_p9 = pneg %p612_p7  ;;  %p397_p4 = scmp.lt.u32.totalorder %s390_s4, %s758_s1 }
  0x1d   : > { %p393_p10 = pnand %p392_p9, %p391_p8 }
  0x1f   : > { %p394_p2 = pneg %p393_p10 }
  0x21   : > { %p399_p5 = pnand %p397_p4, %p394_p2 }
  0x23   : > { %402 = shalt.err (!%p399_p5)
}
  0x24   : > { %s403_s14 = scalar_lea.vmem %s111_s25, 32  ;;  %p411_p11 = scmp.lt.s32.totalorder %s111_s25, %s111_s25 }
  0x25   : > { %p404_p0 = scmp.ne.s32.totalorder %s111_s25, %s403_s14  ;;  %p412_p6 = scmp.lt.s32.totalorder %s403_s14, %s403_s14 }
  0x27   : > { %p406_p1 = pnand %p404_p0, %p392_p9  ;;  %p413_p13 = por %p412_p6, %p411_p11 }
  0x29   : > { %p407_p12 = pneg %p406_p1 }
  0x2b   : > { %p414_p3 = pnand %p413_p13, %p407_p12 }
  0x2d   : > { %417 = shalt.err (!%p414_p3)
}
  0x2e   : > { %340 = dma.hbm_to_vmem [thread:$0]  (!%p612_p7), %s758_s1, 32, %s111_s25, [#allocation6]  }
  0x2f   : > { %s325_s19 = smul.u32 896, %s518_s12  ;;  %s125_s24 = scalar_lea.vmem [#allocation2], %s327_s29 }
  0x30   : > { %s132_s30 = sshll.u32 %s125_s24, 4  ;;  %s647_s26 = scalar_lea.sflag [#allocation3], %s121_s27  ;;  %s640_s30 = int_to_ptr.vmem [resolvable:$true] %s132_s30 }
  0x31   : > { %s645_s5 = scalar_lea.hbm %s757_s0, %s325_s19  ;;  %p773_p11 = scmp.ne.s32.totalorder %s772_s28, 0 }
  0x32   : > { %s418_s6 = scalar_lea.hbm %s645_s5, 896  ;;  %s423_s7 = scalar_lea.hbm %s757_s0, 1792 }
  0x33   : > { %p419_p6 = scmp.ne.s32.totalorder %s645_s5, %s418_s6  ;;  %p420_p12 = pneg %p773_p11 }
  0x34   : > { %p424_p7 = scmp.lt.u32.totalorder %s645_s5, %s757_s0  ;;  %p425_p3 = scmp.lt.u32.totalorder %s423_s7, %s418_s6 }
  0x35   : > { %p421_p13 = pnand %p420_p12, %p419_p6  ;;  %p427_p9 = scmp.lt.u32.totalorder %s418_s6, %s645_s5 }
  0x36   : > { %p426_p8 = por %p425_p3, %p424_p7 }
  0x37   : > { %p422_p1 = pneg %p421_p13 }
  0x38   : > { %p428_p10 = por %p427_p9, %p426_p8 }
  0x3a   : > { %p429_p2 = pnand %p428_p10, %p422_p1 }
  0x3c   : > { %432 = shalt.err (!%p429_p2)
}
  0x3d   : > { %s433_s27 = scalar_lea.vmem %s640_s30, 896  ;;  %s521_s16 = smov [#allocation2]  }
  0x3e   : > { %p434_p4 = scmp.ne.s32.totalorder %s640_s30, %s433_s27  ;;  %s438_s17 = sshll.u32 %s521_s16, 4  ;;  %s439_s17 = int_to_ptr.vmem [resolvable:$false] %s438_s17 }
  0x3f   : > { %s440_s19 = scalar_lea.vmem %s439_s17, 1792  ;;  %p441_p6 = scmp.lt.s32.totalorder %s640_s30, %s439_s17 }
  0x40   : > { %p436_p5 = pnand %p434_p4, %p420_p12  ;;  %p442_p13 = scmp.lt.s32.totalorder %s440_s19, %s433_s27 }
  0x42   : > { %p437_p0 = pneg %p436_p5  ;;  %p443_p7 = por %p442_p13, %p441_p6 }
  0x44   : > { %p444_p3 = pnand %p443_p7, %p437_p0 }
  0x46   : > { %447 = shalt.err (!%p444_p3)
}
  0x47   : > { %s522_s24 = smov 128   ;;  %s523_s3 = smov 8  }
  0x48   : > { %344 = dma.hbm_to_vmem [thread:$0]  (!%p773_p11), %s645_s5, 896, %s640_s30, %s647_s26, %s522_s24, %s522_s24, %s523_s3  }
  0x49   : > { %p774_p12 = scmp.ne.s32.totalorder %s769_s23, 0 }
  0x4a   : > { %s678_s4 = sand.u32 (!%p774_p12), 1, %s510_s10   ;;  %p775_p1 = scmp.ne.s32.totalorder (!%p774_p12), %s766_s20, 0 }
  0x4b   : > { %144 = sbr.rel (%p774_p12) target bundleno = 113 (0x71), region = 28  ;;  %s147_s25 = scalar_lea.sflag (!%p774_p12), [#allocation3], %s678_s4 }
  0x4c   : > { %s328_s6 = smul.u32 (!%p774_p12), 56, %s678_s4 }
  0x4e   : > { %s150_s29 = scalar_lea.vmem (!%p774_p12), [#allocation2], %s328_s6 }
  0x52   : > { %493 = dma.done.wait (%p775_p1), %s147_s25, 896  }
  0x53   : > { %495 = vsyncadd (%p775_p1), %s147_s25, 4294966400  ;;  %p776_p8 = scmp.eq.s32.totalorder %s563_s13, 0 }
  0x55   : > { %497 = dma.done.wait (%p776_p8), [#allocation6], 32   ;;  %p777_p11 = pmov %p776_p8 }
  0x56   : > { %v177_v0 = vld [vmem:[%s150_s29] sm:$0xff]  ;;  %v320_v1 = vld [vmem:[#allocation5] ss:$0 sm:$0xff]  ;;  %v321_v2 = vld [vmem:[#allocation5 + $0x1] ss:$0 sm:$0xff]  ;;  %s690_s23 = scalar_lea.vmem [#allocation7], %s328_s6 }
  0x57   : > { %499 = vsyncadd (%p777_p11), [#allocation6], 4294967264  ;;  %v189_v3 = vmul.f32 %v320_v1, %v177_v0  ;;  %s230_s28 = sshll.u32 %s690_s23, 4  ;;  %v178_v4 = vld [vmem:[%s150_s29 + $0x8] sm:$0xff]  ;;  %v179_v5 = vld [vmem:[%s150_s29 + $0x10] sm:$0xff]  ;;  %s326_s20 = smul.u32 896, %s563_s13  ;;  %s694_s28 = int_to_ptr.vmem [resolvable:$true] %s230_s28 }
  0x58   : > { %v180_v6 = vld [vmem:[%s150_s29 + $0x18] sm:$0xff]  ;;  %vm208_vm0 = vcmask 64512   ;;  %v190_v7 = vmul.f32 %v320_v1, %v178_v4  ;;  %v191_v8 = vmul.f32 %v320_v1, %v179_v5  ;;  %v181_v10 = vld [vmem:[%s150_s29 + $0x20] sm:$0xff]  ;;  %v182_v11 = vld [vmem:[%s150_s29 + $0x28] sm:$0xff]  ;;  %s217_s26 = scalar_lea.sflag [#allocation4], %s678_s4  ;;  %s448_s7 = scalar_lea.vmem %s694_s28, 896 }
  0x59   : > { %v192_v9 = vmul.f32 %v320_v1, %v180_v6  ;;  %v183_v12 = vld [vmem:[%s150_s29 + $0x30] sm:$0xff]  ;;  %v201_v13 = vadd.f32 %v321_v2, %v189_v3  ;;  %v193_v14 = vmul.f32 %v320_v1, %v181_v10  ;;  %v194_v15 = vmul.f32 %v320_v1, %v182_v11  ;;  %s701_s5 = scalar_lea.hbm %s759_s2, %s326_s20  ;;  %p449_p9 = scmp.ne.s32.totalorder %s694_s28, %s448_s7 }
  0x5a   : > { %v195_v16 = vmul.f32 %v320_v1, %v183_v12  ;;  %v202_v17 = vadd.f32 %v321_v2, %v190_v7  ;;  %v203_v18 = vadd.f32 %v321_v2, %v191_v8  ;;  %p778_p10 = scmp.ne.s32.totalorder %s767_s21, 0  ;;  %s524_s8 = smov [#allocation7]  }
  0x5b   : > { %v204_v19 = vadd.f32 %v321_v2, %v192_v9  ;;  %209 = vst.msk [vmem:[%s690_s23] sm:$0xff] %vm208_vm0, %v201_v13  ;;  %v205_v20 = vadd.f32 %v321_v2, %v193_v14  ;;  %v206_v21 = vadd.f32 %v321_v2, %v194_v15  ;;  %s452_s14 = sshll.u32 %s524_s8, 4  ;;  %s453_s14 = int_to_ptr.vmem [resolvable:$false] %s452_s14 }
  0x5c   : > { %v207_v22 = vadd.f32 %v321_v2, %v195_v16  ;;  %210 = vst.msk [vmem:[%s690_s23 + $0x8] sm:$0xff] %vm208_vm0, %v202_v17  ;;  %211 = vst.msk [vmem:[%s690_s23 + $0x10] sm:$0xff] %vm208_vm0, %v203_v18  ;;  %p450_p2 = pnand %p449_p9, %p778_p10  ;;  %s454_s27 = scalar_lea.vmem %s453_s14, 1792 }
  0x5d   : > { %212 = vst.msk [vmem:[%s690_s23 + $0x18] sm:$0xff] %vm208_vm0, %v204_v19  ;;  %213 = vst.msk [vmem:[%s690_s23 + $0x20] sm:$0xff] %vm208_vm0, %v205_v20  ;;  %p455_p5 = scmp.lt.s32.totalorder %s694_s28, %s453_s14  ;;  %p456_p0 = scmp.lt.s32.totalorder %s454_s27, %s448_s7 }
  0x5e   : > { %214 = vst.msk [vmem:[%s690_s23 + $0x28] sm:$0xff] %vm208_vm0, %v206_v21  ;;  %215 = vst.msk [vmem:[%s690_s23 + $0x30] sm:$0xff] %vm208_vm0, %v207_v22  ;;  %p451_p4 = pneg %p450_p2 }
  0x5f   : > { %p457_p6 = por %p456_p0, %p455_p5 }
  0x61   : > { %p458_p13 = pnand %p457_p6, %p451_p4 }
  0x63   : > { %461 = shalt.err (!%p458_p13)
}
  0x64   : > { %s462_s16 = scalar_lea.hbm %s701_s5, 896  ;;  %s466_s24 = scalar_lea.hbm %s759_s2, 1792 }
  0x65   : > { %p463_p7 = scmp.ne.s32.totalorder %s701_s5, %s462_s16  ;;  %p467_p1 = scmp.lt.u32.totalorder %s701_s5, %s759_s2 }
  0x66   : > { %p468_p8 = scmp.lt.u32.totalorder %s466_s24, %s462_s16  ;;  %p470_p9 = scmp.lt.u32.totalorder %s462_s16, %s701_s5 }
  0x67   : > { %p464_p3 = pnand %p463_p7, %p778_p10 }
  0x68   : > { %p469_p11 = por %p468_p8, %p467_p1 }
  0x69   : > { %p465_p12 = pneg %p464_p3 }
  0x6a   : > { %p471_p2 = por %p470_p9, %p469_p11 }
  0x6c   : > { %p472_p4 = pnand %p471_p2, %p465_p12 }
  0x6e   : > { %475 = shalt.err (!%p472_p4)
}
  0x6f   : > { %s525_s25 = smov 128   ;;  %s526_s29 = smov 8  }
  0x70   : > { %335 = dma.vmem_to_hbm [thread:$0]  (%p778_p10), %s694_s28, 896, %s701_s5, %s217_s26, %s525_s25, %s525_s25, %s526_s29  }
  0x71 PF: > { %s245_s23 = sand.u32 1, %s506_s9   ;;  %p779_p5 = scmp.ne.s32.totalorder %s768_s22, 0 }
  0x72   : > { %p780_p0 = scmp.ge.s32.totalorder %s518_s12, 2  ;;  %s246_s20 = scalar_lea.sflag [#allocation4], %s245_s23 }
  0x74   : > { %p346_p6 = pnand %p780_p0, %p779_p5 }
  0x76   : > { %501 = dma.done.wait (!%p346_p6), %s246_s20, 896  }
  0x77   : > { %503 = vsyncadd (!%p346_p6), %s246_s20, 4294966400  ;;  %p16_p13 = scmp.ge.s32.totalorder %s567_s15, 4   ;;  %s781_s9 = smov %s510_s10 }
  0x78   : > { %s782_s10 = smov %s514_s11  ;;  %s783_s11 = smov %s579_s18 }
  0x79   : > { %s784_s12 = smov %s567_s15  ;;  %18 = sbr.rel (!%p16_p13) target bundleno = 6 (0x6), region = 77 }
  0x80   :  { %251 = vsyncpa [#allocation3], 1 }
  0x81   :  { %253 = vsyncpa [#allocation3 + $0x1], 1 }
  0x82   :  { %254 = vsyncpa [#allocation6], 1 }
  0x83   :  { %255 = vsyncpa [#allocation4], 1 }
  0x84   :  { %257 = vsyncpa [#allocation4 + $0x1], 1 }

// kernel: gdc_block.2
= control target key start
LH: loop header
LB: loop body
LE: loop exit
PB: predicated region body
PF: predicated region fallthrough
CT: control target
= control target key end

     0   :  { %11 = vsyncpa [#allocation3], 0  ;;  %s1689_s0 = inlined_call_operand.hbm [shape: f32[98,36], index: 0, kind: input, shape index: {}]   ;;  %s1690_s1 = inlined_call_operand.hbm [shape: f32[36,8], index: 1, kind: input, shape index: {}]   ;;  %s1691_s2 = inlined_call_operand.hbm [shape: f32[112,8], index: 2, kind: output, shape index: {0}]   ;;  %s1692_s3 = inlined_call_operand.hbm [shape: f32[2,1,8], index: 3, kind: output, shape index: {1}]   ;;  %s1693_s4 = inlined_call_operand.hbm [shape: f32[2,1,8], index: 4, kind: output, shape index: {2}]   ;;  %s1694_s5 = inlined_call_operand.hbm [shape: f32[2,1,8], index: 5, kind: output, shape index: {3}]  }
   0x1   :  { %13 = vsyncpa [#allocation3 + $0x1], 0 }
   0x2   :  { %14 = vsyncpa [#allocation6], 0 }
   0x3   :  { %15 = vsyncpa [#allocation4], 0 }
   0x4   :  { %17 = vsyncpa [#allocation4 + $0x1], 0 }
   0x5   :  { %18 = vsyncpa [#allocation9], 0 }
   0x6   :  { %20 = vsyncpa [#allocation9 + $0x1], 0 }
   0x7   :  { %21 = vsyncpa [#allocation12], 0 }
   0x8   :  { %23 = vsyncpa [#allocation12 + $0x1], 0  ;;  %s1220_s18 = smov 0   ;;  %s1222_s19 = smov 0  }
   0x9   :  { %s1224_s20 = smov 0   ;;  %s1226_s21 = smov 0  }
   0xa LB: > { %s1241_s22 = sadd.s32 4294967295, %s1173_s21   ;;  %s787_s23 = sadd.s32 4294967294, %s1173_s21   ;;  %s1173_s21 = sphi %s1226_s21, %s1715_s21   ;;  %s1169_s20 = sphi %s1224_s20, %s1714_s20   ;;  %s1165_s19 = sphi %s1222_s19, %s1713_s19   ;;  %s1161_s18 = sphi %s1220_s18, %s1712_s18  }
   0xb   : > { %s1245_s24 = sadd.s32 1, %s1173_s21   ;;  %s36_s25 = sadd.s32 1, %s1169_s20 }
   0xc   : > { %s33_s26 = ssub.s32 %s1173_s21, %s1245_s24  ;;  %p43_p0 = scmp.ne.s32.totalorder %s1169_s20, %s1165_s19 }
   0xd   : > { %p34_p1 = scmp.eq.s32.totalorder %s33_s26, 0  ;;  %p44_p2 = scmp.eq.s32.totalorder %s1173_s21, 0 }
   0xe   : > { %p49_p3 = scmp.ne.s32.totalorder %s1165_s19, %s1161_s18  ;;  %p1695_p4 = scmp.eq.s32.totalorder %s1241_s22, 0 }
   0xf   : > { %s1257_s27 = scalar_select %p34_p1, %s1169_s20, %s36_s25  }
  0x10   : > { %p1259_p5 = por %p44_p2, %p43_p0  ;;  %p1265_p6 = por %p1695_p4, %p49_p3 }
  0x11   : > { %p94_p7 = scmp.eq.s32.totalorder %s1241_s22, 1  ;;  %p100_p8 = scmp.eq.s32.totalorder %s787_s23, 1 }
  0x12   : > { %s1699_s28 = scalar_select %p1259_p5, 1, 0 }
  0x13   : > { %s1700_s29 = scalar_select %p1265_p6, 1, 0 }
  0x14   : > { %p788_p9 = scmp.ge.s32.totalorder %s1173_s21, 1  ;;  %p185_p10 = scmp.lt.s32.totalorder %s1173_s21, 3 }
  0x15   : > { %p1274_p11 = por %p94_p7, %p43_p0  ;;  %p1278_p12 = por %p100_p8, %p49_p3 }
  0x16   : > { %p1282_p13 = pnand %p788_p9, %p185_p10  ;;  %s1175_s8 = smov [#allocation5]  }
  0x17   : > { %s1701_s30 = scalar_select %p1274_p11, 1, 0 }
  0x18   : > { %s1702_s6 = scalar_select %p1278_p12, 1, 0 }
  0x19   : > { %s1703_s7 = scalar_select %p1282_p13, 1, 0 }
  0x1a   : > { %p891_p1 = pneg %p1282_p13  ;;  %s197_s9 = sshll.u32 %s1175_s8, 4  ;;  %s198_s9 = int_to_ptr.vmem [resolvable:$true] %s197_s9 }
  0x1b   : > { %s955_s13 = scalar_lea.hbm %s1690_s1, 640 }
  0x1c   : > { %p1290_p2 = pnand %p891_p1, %p1695_p4  ;;  %p956_p0 = scmp.ne.s32.totalorder %s1690_s1, %s955_s13 }
  0x1d   : > { %p962_p9 = scmp.lt.u32.totalorder %s955_s13, %s1690_s1 }
  0x1e   : > { %p957_p3 = pneg %p1290_p2 }
  0x20   : > { %p958_p7 = pnand %p957_p3, %p956_p0 }
  0x22   : > { %p959_p8 = pneg %p958_p7 }
  0x24   : > { %p964_p10 = pnand %p962_p9, %p959_p8 }
  0x26   : > { %967 = shalt.err (!%p964_p10)
}
  0x27   : > { %s968_s25 = scalar_lea.vmem %s198_s9, 640  ;;  %p976_p11 = scmp.lt.s32.totalorder %s198_s9, %s198_s9 }
  0x28   : > { %p969_p1 = scmp.ne.s32.totalorder %s198_s9, %s968_s25  ;;  %p977_p6 = scmp.lt.s32.totalorder %s968_s25, %s968_s25 }
  0x2a   : > { %p971_p4 = pnand %p969_p1, %p957_p3  ;;  %p978_p13 = por %p977_p6, %p976_p11 }
  0x2c   : > { %p972_p12 = pneg %p971_p4 }
  0x2e   : > { %p979_p5 = pnand %p978_p13, %p972_p12 }
  0x30   : > { %982 = shalt.err (!%p979_p5)
}
  0x31   : > { %s1176_s26 = smov 128   ;;  %s1177_s8 = smov 8  }
  0x32   : > { %894 = dma.hbm_to_vmem [thread:$0]  (!%p1290_p2), %s1690_s1, 640, %s198_s9, [#allocation6], %s1176_s26, %s1176_s26, %s1177_s8  }
  0x33   : > { %p790_p0 = scmp.ge.s32.totalorder %s1173_s21, 2 }
  0x34   : > { %p1705_p4 = scmp.ne.s32.totalorder (!%p790_p0), %s1699_s28, 0 }
  0x35   : > { %207 = sbr.rel (%p790_p0) target bundleno = 95 (0x5f), region = 20 }
  0x3c   : > { %210 = sbr.rel (!%p1705_p4) target bundleno = 95 (0x5f), region = 24  ;;  %s211_s13 = sand.u32 (%p1705_p4), 1, %s1169_s20  }
  0x3d   : > { %s216_s14 = smul.u32 (%p1705_p4), 7, %s1173_s21  ;;  %s1320_s17 = scalar_lea.sflag (%p1705_p4), [#allocation3], %s211_s13 }
  0x3e   : > { %s876_s15 = smul.u32 (%p1705_p4), 56, %s211_s13 }
  0x3f   : > { %s217_s16 = ssub.s32 (%p1705_p4), 13, %s216_s14 }
  0x40   : > { %p218_p5 = scmp.lt.s32.totalorder (%p1705_p4), %s217_s16, 7  ;;  %s215_s25 = scalar_lea.vmem (%p1705_p4), [#allocation2], %s876_s15 }
  0x43   : > { %s1717_s16 = smov (!%p218_p5, %s217_s16), 7 }
  0x44   : > { %s1317_s10 = sshll.u32 %s1717_s16, 7 }
  0x45   : > { %s222_s9 = ssub.s32 896, %s1317_s10 }
  0x46   : > { %223 = vsyncadd %s1320_s17, %s222_s9  ;;  %p792_p6 = scmp.ne.s32.totalorder %s1317_s10, 0  ;;  %s817_s28 = smul.u32 896, %s1173_s21 }
  0x47   : > { %s228_s26 = sshll.u32 %s215_s25, 4  ;;  %s987_s16 = scalar_lea.hbm %s1689_s0, 1664  ;;  %s1330_s26 = int_to_ptr.vmem [resolvable:$true] %s228_s26 }
  0x48   : > { %s1328_s12 = scalar_lea.hbm %s1689_s0, %s817_s28 }
  0x49   : > { %s983_s13 = scalar_lea.hbm %s1328_s12, %s1317_s10  ;;  %p988_p2 = scmp.lt.u32.totalorder %s1328_s12, %s1689_s0 }
  0x4a   : > { %p984_p11 = scmp.ne.s32.totalorder %s1328_s12, %s983_s13  ;;  %p989_p3 = scmp.lt.u32.totalorder %s987_s16, %s983_s13 }
  0x4b   : > { %p991_p8 = scmp.lt.u32.totalorder %s983_s13, %s1328_s12 }
  0x4c   : > { %p985_p12 = pnand %p984_p11, %p792_p6  ;;  %p990_p7 = por %p989_p3, %p988_p2 }
  0x4e   : > { %p986_p13 = pneg %p985_p12  ;;  %p992_p9 = por %p991_p8, %p990_p7 }
  0x50   : > { %p993_p10 = pnand %p992_p9, %p986_p13 }
  0x52   : > { %996 = shalt.err (!%p993_p10)
}
  0x53   : > { %s997_s28 = scalar_lea.vmem %s1330_s26, %s1317_s10  ;;  %s1178_s8 = smov [#allocation2]  }
  0x54   : > { %p998_p1 = scmp.ne.s32.totalorder %s1330_s26, %s997_s28  ;;  %s1001_s11 = sshll.u32 %s1178_s8, 4  ;;  %s1002_s11 = int_to_ptr.vmem [resolvable:$false] %s1001_s11 }
  0x55   : > { %s1003_s14 = scalar_lea.vmem %s1002_s11, 1792  ;;  %p1004_p11 = scmp.lt.s32.totalorder %s1330_s26, %s1002_s11 }
  0x56   : > { %p999_p4 = pnand %p998_p1, %p792_p6  ;;  %p1005_p12 = scmp.lt.s32.totalorder %s1003_s14, %s997_s28 }
  0x58   : > { %p1000_p5 = pneg %p999_p4  ;;  %p1006_p2 = por %p1005_p12, %p1004_p11 }
  0x5a   : > { %p1007_p3 = pnand %p1006_p2, %p1000_p5 }
  0x5c   : > { %1010 = shalt.err (!%p1007_p3)
}
  0x5d   : > { %s1179_s13 = smov 128   ;;  %s1180_s15 = smov 8  }
  0x5e   : > { %234 = dma.hbm_to_vmem [thread:$0]  (%p792_p6), %s1328_s12, %s1317_s10, %s1330_s26, %s1320_s17, %s1179_s13, %s1179_s13, %s1180_s15  }
  0x5f PF: > { %p1706_p13 = scmp.ne.s32.totalorder %s1703_s7, 0 }
  0x60   : > { %s1360_s16 = sand.u32 (!%p1706_p13), 1, %s1165_s19   ;;  %p1707_p7 = scmp.ne.s32.totalorder (!%p1706_p13), %s1700_s29, 0 }
  0x61   : > { %240 = sbr.rel (%p1706_p13) target bundleno = 456 (0x1c8), region = 28  ;;  %s243_s25 = scalar_lea.sflag (!%p1706_p13), [#allocation3], %s1360_s16 }
  0x62   : > { %s877_s9 = smul.u32 (!%p1706_p13), 56, %s1360_s16 }
  0x64   : > { %s1366_s28 = scalar_lea.vmem (!%p1706_p13), [#allocation2], %s877_s9 }
  0x68   : > { %1140 = dma.done.wait (%p1707_p7), %s243_s25, 896  }
  0x69   : > { %1142 = vsyncadd (%p1707_p7), %s243_s25, 4294966400  ;;  %p1708_p6 = scmp.eq.s32.totalorder %s1241_s22, 0 }
  0x6b   : > { %1144 = dma.done.wait (%p1708_p6), [#allocation6], 640   ;;  %p1709_p8 = pmov %p1708_p6 }
  0x6c   : > { %v1181_v0 = vmov 0.0|0.0   ;;  %vm1182_vm0 = vmmov 0   ;;  %v1183_v1 = vmov 0.0   ;;  %v302_v2 = vld [vmem:[#allocation5] sm:$0xff]  ;;  %v303_v3 = vld [vmem:[#allocation5 + $0x8] sm:$0xff]  ;;  %v304_v4 = vld [vmem:[#allocation5 + $0x10] sm:$0xff]  ;;  %v441_v16 = vlaneseq }
  0x6d   : > { %1146 = vsyncadd (%p1709_p8), [#allocation6], 4294966656  ;;  %864 = vmatprep.subr.bf16.mxu0 %v1181_v0  ;;  %870 = vmatprep.subr.bf16.mxu1 %v1181_v0  ;;  %v865_v5 = vpack.c.bf16 %v303_v3, %v302_v2  ;;  %v305_v6 = vld [vmem:[#allocation5 + $0x18] sm:$0xff]  ;;  %v306_v8 = vld [vmem:[#allocation5 + $0x20] sm:$0xf]  ;;  %vm329_vm1 = vcmask 1043456  }
  0x6e   : > { %843 = vmatprep.mubr.msk.f32.mxu0 %vm1182_vm0, %v1183_v1  ;;  %855 = vmatprep.mubr.msk.f32.mxu1 %vm1182_vm0, %v1183_v1  ;;  %v868_v7 = vpack.c.bf16 %v305_v6, %v304_v4  ;;  %v295_v9 = vld [vmem:[%s1366_s28] sm:$0xff]  ;;  %vm307_vm2 = vcmask 293888   ;;  %v296_v11 = vld [vmem:[%s1366_s28 + $0x8] sm:$0xff]  ;;  %v297_v13 = vld [vmem:[%s1366_s28 + $0x10] sm:$0xff]  ;;  %s449_s29 = smul.u32 56, %s1241_s22  ;;  %v442_v17 = vshrl.u32 %v441_v16, 7 }
  0x6f   : > { %866 = vmatpush3.bf16.msra.mxu0 %v865_v5  ;;  %873 = vmatpush3.bf16.msra.mxu1 %v865_v5  ;;  %v299_v10 = vld [vmem:[%s1366_s28 + $0x20] sm:$0xff]  ;;  %v300_v12 = vld [vmem:[%s1366_s28 + $0x28] sm:$0xff]  ;;  %v301_v14 = vld [vmem:[%s1366_s28 + $0x30] sm:$0xff]  ;;  %vm433_vm3 = vcmask 64512   ;;  %s1411_s10 = scalar_lea.vmem [#allocation7], %s877_s9  ;;  %s820_s12 = smul.u32 896, %s1241_s22 }
  0x70   : > { %867 = vmatprep.subr.bf16.mxu0 %v1181_v0  ;;  %871 = vmatprep.subr.bf16.mxu1 %v1181_v0  ;;  %v298_v15 = vld [vmem:[%s1366_s28 + $0x18] sm:$0xff]  ;;  %v450_v18 = vstv %s449_s29  ;;  %v443_v19 = vadd.s32 8, %v442_v17  ;;  %v444_v21 = vadd.s32 16, %v442_v17  ;;  %s1400_s7 = ssub.s32 98, %s449_s29  ;;  %v446_v28 = vadd.s32 32, %v442_v17  ;;  %s584_s17 = sshll.u32 %s1411_s10, 4  ;;  %s1452_s17 = int_to_ptr.vmem [resolvable:$true] %s584_s17 }
  0x71   : > { %v1398_v20 = vadd.s32 %v450_v18, %v442_v17  ;;  %p506_p9 = scmp.lt.s32.totalorder %s1400_s7, 56  ;;  %v445_v29 = vadd.s32 24, %v442_v17  ;;  %p806_p10 = scmp.gt.s32.totalorder %s1400_s7, 1  ;;  %v447_v33 = vadd.s32 40, %v442_v17  ;;  %v448_v34 = vadd.s32 48, %v442_v17 }
  0x72   : > { %v1402_v22 = vadd.s32 %v450_v18, %v443_v19  ;;  %v1417_v26 = vadd.s32 %v450_v18, %v444_v21  ;;  %v1447_v40 = vadd.s32 %v450_v18, %v446_v28  ;;  %s1481_s14 = scalar_lea.hbm %s1691_s2, %s820_s12  ;;  %s559_s13 = scalar_lea.sflag [#allocation4], %s1360_s16 }
  0x73   : > { %869 = vmatpush3.bf16.msra.mxu0 %v868_v7  ;;  %874 = vmatpush3.bf16.msra.mxu1 %v868_v7  ;;  %vm458_vm4 = vcmp.lt.s32.totalorder %v1398_v20, 98  ;;  %s507_s26 = scalar_select %p506_p9, %s1400_s7, 56  ;;  %v1449_v41 = vadd.s32 %v450_v18, %v445_v29  ;;  %v1456_v44 = vadd.s32 %v450_v18, %v447_v33  ;;  %v1460_v46 = vadd.s32 %v450_v18, %v448_v34 }
  0x74   : > { %841 = vmatprep.subr.mxu0 %v1183_v1  ;;  %872 = vmatprep.subr.mxu1 %v1183_v1  ;;  %vm459_vm5 = vcmp.lt.s32.totalorder %v1402_v22, 98  ;;  %vm460_vm6 = vcmp.lt.s32.totalorder %v1417_v26, 98  ;;  %vm462_vm7 = vcmp.lt.s32.totalorder %v1447_v40, 98  ;;  %s1011_s15 = scalar_lea.vmem %s1452_s17, 896  ;;  %p1710_p4 = scmp.ne.s32.totalorder %s1701_s30, 0 }
  0x75   : > { %s1719_s26 = smov (!%p806_p10, %s507_s26), 1  ;;  %vm461_vm8 = vcmp.lt.s32.totalorder %v1449_v41, 98  ;;  %vm463_vm9 = vcmp.lt.s32.totalorder %v1456_v44, 98  ;;  %vm464_vm10 = vcmp.lt.s32.totalorder %v1460_v46, 98  ;;  %p1012_p1 = scmp.ne.s32.totalorder %s1452_s17, %s1011_s15 }
  0x76   : > { %s1184_s9 = smov [#allocation7]  }
  0x77   : > { %842 = vmatpush3.msk.msra.mxu0 %vm329_vm1, %v306_v8  ;;  %875 = vmatpush3.msk.msra.mxu1 %vm329_vm1, %v306_v8  ;;  %p1013_p5 = pnand %p1012_p1, %p1710_p4  ;;  %s1015_s25 = sshll.u32 %s1184_s9, 4  ;;  %s1016_s25 = int_to_ptr.vmem [resolvable:$false] %s1015_s25 }
  0x78   : > { %844 = vmatmul.mubr.msk.f32.vlgmr.msra.gmra.mrb[0].mxu0 %vm307_vm2, %v295_v9  ;;  %856 = vmatmul.mubr.msk.f32.vlgmr.msra.gmra.mrb[0].mxu1 %vm307_vm2, %v299_v10  ;;  %s1017_s28 = scalar_lea.vmem %s1016_s25, 1792  ;;  %p1018_p12 = scmp.lt.s32.totalorder %s1452_s17, %s1016_s25 }
  0x79   : > { %846 = vmatprep.mubr.msk.f32.mxu0 %vm1182_vm0, %v1183_v1  ;;  %858 = vmatprep.mubr.msk.f32.mxu1 %vm1182_vm0, %v1183_v1  ;;  %p1014_p11 = pneg %p1013_p5  ;;  %p1019_p2 = scmp.lt.s32.totalorder %s1017_s28, %s1011_s15 }
  0x7b   : > { %p1020_p3 = por %p1019_p2, %p1018_p12 }
  0x7c   : > { %847 = vmatmul.mubr.msk.f32.gmra.mrb[2].mxu0 %vm307_vm2, %v296_v11  ;;  %859 = vmatmul.mubr.msk.f32.gmra.mrb[2].mxu1 %vm307_vm2, %v300_v12 }
  0x7d   : > { %849 = vmatprep.mubr.msk.f32.mxu0 %vm1182_vm0, %v1183_v1  ;;  %861 = vmatprep.mubr.msk.f32.mxu1 %vm1182_vm0, %v1183_v1  ;;  %p1021_p13 = pnand %p1020_p3, %p1014_p11 }
  0x80   : > { %850 = vmatmul.mubr.msk.f32.gmra.mrb[4].mxu0 %vm307_vm2, %v297_v13  ;;  %862 = vmatmul.mubr.msk.f32.gmra.mrb[4].mxu1 %vm307_vm2, %v301_v14 }
  0x81   : > { %852 = vmatprep.mubr.msk.f32.mxu0 %vm1182_vm0, %v1183_v1 }
  0x84   : > { %853 = vmatmul.mubr.msk.f32.gmra.mrb[6].mxu0 %vm307_vm2, %v298_v15 }
 0x14b   : > { %v1404_v23 = vpop.f32.mrb[0].mxu0  ;;  %v1407_v24 = vpop.f32.mrb[0].mxu1 }
 0x14c   : > { %434 = vst.msk [vmem:[%s1411_s10] sm:$0xff] %vm433_vm3, %v1404_v23  ;;  %v845_v25 = vpop.f32.mrb[1].mxu0  ;;  %438 = vst.msk [vmem:[%s1411_s10 + $0x20] sm:$0xff] %vm433_vm3, %v1407_v24  ;;  %v857_v27 = vpop.f32.mrb[1].mxu1  ;;  %v479_v30 = vsel %vm458_vm4, %v1404_v23, 0.0  ;;  %v483_v53 = vsel %vm462_vm7, %v1407_v24, 0.0 }
 0x14d   : > { %v486_v38 = vsel %vm433_vm3, %v479_v30, 0.0 }
 0x14f   : > { %v1428_v31 = vpop.f32.mrb[2].mxu0  ;;  %v1430_v32 = vpop.f32.mrb[2].mxu1 }
 0x150   : > { %435 = vst.msk [vmem:[%s1411_s10 + $0x8] sm:$0xff] %vm433_vm3, %v1428_v31  ;;  %v480_v35 = vsel %vm459_vm5, %v1428_v31, 0.0  ;;  %v848_v36 = vpop.f32.mrb[3].mxu0  ;;  %439 = vst.msk [vmem:[%s1411_s10 + $0x28] sm:$0xff] %vm433_vm3, %v1430_v32  ;;  %v860_v37 = vpop.f32.mrb[3].mxu1 }
 0x151   : > { %v487_v39 = vsel %vm433_vm3, %v480_v35, 0.0 }
 0x152   : > { %v488_v42 = vadd.f32 %v487_v39, %v486_v38 }
 0x153   : > { %v1454_v43 = vpop.f32.mrb[4].mxu0  ;;  %v1458_v45 = vpop.f32.mrb[4].mxu1 }
 0x154   : > { %436 = vst.msk [vmem:[%s1411_s10 + $0x10] sm:$0xff] %vm433_vm3, %v1454_v43  ;;  %v481_v47 = vsel %vm460_vm6, %v1454_v43, 0.0  ;;  %v851_v48 = vpop.f32.mrb[5].mxu0  ;;  %440 = vst.msk [vmem:[%s1411_s10 + $0x30] sm:$0xff] %vm433_vm3, %v1458_v45  ;;  %v863_v49 = vpop.f32.mrb[5].mxu1 }
 0x155   : > { %v489_v50 = vsel %vm433_vm3, %v481_v47, 0.0 }
 0x156   : > { %v490_v51 = vadd.f32 %v489_v50, %v488_v42 }
 0x157   : > { %v1483_v52 = vpop.f32.mrb[6].mxu0 }
 0x158   : > { %437 = vst.msk [vmem:[%s1411_s10 + $0x18] sm:$0xff] %vm433_vm3, %v1483_v52  ;;  %v482_v54 = vsel %vm461_vm8, %v1483_v52, 0.0  ;;  %v854_v55 = vpop.f32.mrb[7].mxu0 }
 0x159   : > { %v491_v56 = vsel %vm433_vm3, %v482_v54, 0.0 }
 0x15a   : > { %1024 = shalt.err (!%p1021_p13)
}
 0x15b   : > { %s1025_s29 = scalar_lea.hbm %s1481_s14, 896  ;;  %s1029_s12 = scalar_lea.hbm %s1691_s2, 1792 }
 0x15c   : > { %p1026_p7 = scmp.ne.s32.totalorder %s1481_s14, %s1025_s29  ;;  %p1030_p9 = scmp.lt.u32.totalorder %s1481_s14, %s1691_s2 }
 0x15d   : > { %p1031_p10 = scmp.lt.u32.totalorder %s1029_s12, %s1025_s29  ;;  %p1033_p5 = scmp.lt.u32.totalorder %s1025_s29, %s1481_s14 }
 0x15e   : > { %p1027_p6 = pnand %p1026_p7, %p1710_p4 }
 0x15f   : > { %p1032_p1 = por %p1031_p10, %p1030_p9 }
 0x160   : > { %p1028_p8 = pneg %p1027_p6 }
 0x161   : > { %p1034_p11 = por %p1033_p5, %p1032_p1 }
 0x163   : > { %p1035_p12 = pnand %p1034_p11, %p1028_p8 }
 0x165   : > { %1038 = shalt.err (!%p1035_p12)
}
 0x166   : > { %s1185_s15 = smov 128   ;;  %s1186_s9 = smov 8   ;;  %v492_v57 = vadd.f32 %v491_v56, %v490_v51  ;;  %v484_v58 = vsel %vm463_vm9, %v1430_v32, 0.0  ;;  %v485_v59 = vsel %vm464_vm10, %v1458_v45, 0.0  ;;  %v493_v60 = vsel %vm433_vm3, %v483_v53, 0.0 }
 0x167   : > { %883 = dma.vmem_to_hbm [thread:$0]  (%p1710_p4), %s1452_s17, 896, %s1481_s14, %s559_s13, %s1185_s15, %s1185_s15, %s1186_s9   ;;  %v495_v62 = vsel %vm433_vm3, %v484_v58, 0.0  ;;  %v497_v63 = vsel %vm433_vm3, %v485_v59, 0.0  ;;  %vm554_vm11 = vcmask 57344  }
 0x168   : > { %s510_s25 = scvt.s32.f32 %s1719_s26  ;;  %v494_v61 = vadd.f32 %v493_v60, %v492_v57  ;;  %s563_s17 = sand.u32 1, %s1241_s22  }
 0x169   : > { %s1533_s14 = sshll.u32 %s1241_s22, 4  ;;  %s276_s26 = scalar_lea.vmem [#allocation8], %s1360_s16 }
 0x16a   : > { %v496_v0 = vadd.f32 %v495_v62, %v494_v61  ;;  %v511_v1 = vstv %s510_s25  ;;  %s600_s13 = sshll.u32 %s276_s26, 4  ;;  %s288_s28 = scalar_lea.vmem [#allocation11], %s1360_s16  ;;  %s1545_s13 = int_to_ptr.vmem [resolvable:$true] %s600_s13 }
 0x16b   : > { %953 = vrcp.f32 %v511_v1  ;;  %s626_s29 = sshll.u32 %s288_s28, 4  ;;  %s1543_s12 = scalar_lea.hbm %s1692_s3, %s1533_s14  ;;  %s1556_s29 = int_to_ptr.vmem [resolvable:$true] %s626_s29 }
 0x16c   : > { %v498_v2 = vadd.f32 %v497_v63, %v496_v0  ;;  %s1554_s11 = scalar_lea.hbm %s1694_s5, %s1533_s14  ;;  %s1558_s15 = scalar_lea.sflag [#allocation9], %s563_s17 }
 0x16d   : > { %s1039_s9 = scalar_lea.vmem %s1545_s13, 16  ;;  %s1187_s25 = smov [#allocation8]  }
 0x16e   : > { %v499_v3 = vrot.slane %v498_v2, 4  ;;  %p1040_p2 = scmp.ne.s32.totalorder %s1545_s13, %s1039_s9  ;;  %s1043_s7 = sshll.u32 %s1187_s25, 4  ;;  %s1044_s7 = int_to_ptr.vmem [resolvable:$false] %s1043_s7 }
 0x16f   : > { %s1045_s10 = scalar_lea.vmem %s1044_s7, 32  ;;  %p1046_p7 = scmp.lt.s32.totalorder %s1545_s13, %s1044_s7 }
 0x170   : > { %v500_v4 = vadd.f32 %v499_v3, %v498_v2  ;;  %p1041_p3 = pnand %p1040_p2, %p1710_p4  ;;  %p1047_p6 = scmp.lt.s32.totalorder %s1045_s10, %s1039_s9 }
 0x172   : > { %v501_v5 = vrot.slane %v500_v4, 2  ;;  %p1042_p13 = pneg %p1041_p3  ;;  %p1048_p8 = por %p1047_p6, %p1046_p7 }
 0x174   : > { %v502_v6 = vadd.f32 %v501_v5, %v500_v4  ;;  %p1049_p9 = pnand %p1048_p8, %p1042_p13 }
 0x175   : > { %v954_v8 = vpop.eup %953 }
 0x176   : > { %v503_v7 = vrot.slane %v502_v6, 1 }
 0x178   : > { %v504_v9 = vadd.f32 %v503_v7, %v502_v6 }
 0x17a   : > { %v1547_v10 = vmul.f32 %v954_v8, %v504_v9  ;;  %555 = vst.msk [vmem:[%s276_s26] sm:$0x1] %vm554_vm11, %v504_v9 }
 0x17b   : > { %1052 = shalt.err (!%p1049_p9)
}
 0x17c   : > { %s1053_s17 = scalar_lea.hbm %s1543_s12, 16  ;;  %s1057_s8 = scalar_lea.hbm %s1692_s3, 32 }
 0x17d   : > { %p1054_p10 = scmp.ne.s32.totalorder %s1543_s12, %s1053_s17  ;;  %p1058_p11 = scmp.lt.u32.totalorder %s1543_s12, %s1692_s3 }
 0x17e   : > { %p1059_p12 = scmp.lt.u32.totalorder %s1057_s8, %s1053_s17  ;;  %p1061_p3 = scmp.lt.u32.totalorder %s1053_s17, %s1543_s12 }
 0x17f   : > { %p1055_p1 = pnand %p1054_p10, %p1710_p4 }
 0x180   : > { %p1060_p2 = por %p1059_p12, %p1058_p11 }
 0x181   : > { %p1056_p5 = pneg %p1055_p1 }
 0x182   : > { %p1062_p13 = por %p1061_p3, %p1060_p2 }
 0x184   : > { %p1063_p7 = pnand %p1062_p13, %p1056_p5 }
 0x186   : > { %1066 = shalt.err (!%p1063_p7)
}
 0x187   : > { %884 = dma.vmem_to_hbm [thread:$0]  (%p1710_p4), %s1545_s13, 16, %s1543_s12, %s1558_s15   ;;  %v514_v11 = vsub.f32 %v1404_v23, %v1547_v10  ;;  %v515_v12 = vsub.f32 %v1428_v31, %v1547_v10  ;;  %v516_v13 = vsub.f32 %v1454_v43, %v1547_v10  ;;  %v517_v14 = vsub.f32 %v1483_v52, %v1547_v10  ;;  %557 = vst.msk [vmem:[%s288_s28] sm:$0x1] %vm554_vm11, %v1547_v10 }
 0x188   : > { %v518_v15 = vsub.f32 %v1407_v24, %v1547_v10  ;;  %v519_v16 = vsub.f32 %v1430_v32, %v1547_v10  ;;  %v520_v17 = vsub.f32 %v1458_v45, %v1547_v10  ;;  %s572_s13 = scalar_lea.sflag [#allocation12], %s1360_s16  ;;  %s1067_s12 = scalar_lea.vmem %s1556_s29, 16 }
 0x189   : > { %p1068_p6 = scmp.ne.s32.totalorder %s1556_s29, %s1067_s12  ;;  %s1188_s9 = smov [#allocation11]  }
 0x18a   : > { %s1071_s10 = sshll.u32 %s1188_s9, 4  ;;  %s1072_s10 = int_to_ptr.vmem [resolvable:$false] %s1071_s10 }
 0x18b   : > { %p1069_p8 = pnand %p1068_p6, %p1710_p4  ;;  %s1073_s17 = scalar_lea.vmem %s1072_s10, 32 }
 0x18c   : > { %p1074_p10 = scmp.lt.s32.totalorder %s1556_s29, %s1072_s10  ;;  %p1075_p1 = scmp.lt.s32.totalorder %s1073_s17, %s1067_s12 }
 0x18d   : > { %p1070_p9 = pneg %p1069_p8 }
 0x18e   : > { %p1076_p5 = por %p1075_p1, %p1074_p10 }
 0x190   : > { %p1077_p11 = pnand %p1076_p5, %p1070_p9 }
 0x192   : > { %1080 = shalt.err (!%p1077_p11)
}
 0x193   : > { %s1081_s28 = scalar_lea.hbm %s1554_s11, 16  ;;  %s1085_s8 = scalar_lea.hbm %s1694_s5, 32 }
 0x194   : > { %p1082_p12 = scmp.ne.s32.totalorder %s1554_s11, %s1081_s28  ;;  %p1086_p13 = scmp.lt.u32.totalorder %s1554_s11, %s1694_s5 }
 0x195   : > { %p1087_p7 = scmp.lt.u32.totalorder %s1085_s8, %s1081_s28  ;;  %p1089_p8 = scmp.lt.u32.totalorder %s1081_s28, %s1554_s11 }
 0x196   : > { %p1083_p2 = pnand %p1082_p12, %p1710_p4 }
 0x197   : > { %p1088_p6 = por %p1087_p7, %p1086_p13 }
 0x198   : > { %p1084_p3 = pneg %p1083_p2 }
 0x199   : > { %p1090_p9 = por %p1089_p8, %p1088_p6 }
 0x19b   : > { %p1091_p10 = pnand %p1090_p9, %p1084_p3 }
 0x19d   : > { %1094 = shalt.err (!%p1091_p10)
}
 0x19e   : > { %886 = dma.vmem_to_hbm [thread:$0]  (%p1710_p4), %s1556_s29, 16, %s1554_s11, %s572_s13   ;;  %v521_v18 = vsel %vm458_vm4, %v514_v11, 0.0  ;;  %v522_v19 = vsel %vm459_vm5, %v515_v12, 0.0  ;;  %v523_v21 = vsel %vm460_vm6, %v516_v13, 0.0  ;;  %v524_v23 = vsel %vm461_vm8, %v517_v14, 0.0 }
 0x19f   : > { %v528_v24 = vmul.f32 %v521_v18, %v521_v18  ;;  %v529_v25 = vmul.f32 %v522_v19, %v522_v19  ;;  %v530_v27 = vmul.f32 %v523_v21, %v523_v21  ;;  %v525_v28 = vsel %vm462_vm7, %v518_v15, 0.0  ;;  %s282_s29 = scalar_lea.vmem [#allocation10], %s1360_s16  ;;  %s1648_s9 = scalar_lea.hbm %s1693_s4, %s1533_s14 }
 0x1a0   : > { %v531_v30 = vmul.f32 %v524_v23, %v524_v23  ;;  %v526_v22 = vsel %vm463_vm9, %v519_v16, 0.0  ;;  %v532_v26 = vmul.f32 %v525_v28, %v525_v28  ;;  %v527_v33 = vsel %vm464_vm10, %v520_v17, 0.0  ;;  %s613_s11 = sshll.u32 %s282_s29, 4  ;;  %s1189_s17 = smov [#allocation10]   ;;  %s614_s11 = int_to_ptr.vmem [resolvable:$true] %s613_s11 }
 0x1a1   : > { %v535_v29 = vsel %vm433_vm3, %v528_v24, 0.0  ;;  %v536_v20 = vsel %vm433_vm3, %v529_v25, 0.0  ;;  %v538_v32 = vsel %vm433_vm3, %v530_v27, 0.0  ;;  %v533_v35 = vmul.f32 %v526_v22, %v526_v22  ;;  %s1095_s10 = scalar_lea.vmem %s614_s11, 16  ;;  %s1099_s28 = sshll.u32 %s1189_s17, 4  ;;  %s1100_s28 = int_to_ptr.vmem [resolvable:$false] %s1099_s28 }
 0x1a2   : > { %v537_v31 = vadd.f32 %v536_v20, %v535_v29  ;;  %v540_v36 = vsel %vm433_vm3, %v531_v30, 0.0  ;;  %v534_v38 = vmul.f32 %v527_v33, %v527_v33  ;;  %v542_v39 = vsel %vm433_vm3, %v532_v26, 0.0  ;;  %p1096_p1 = scmp.ne.s32.totalorder %s614_s11, %s1095_s10  ;;  %s1101_s16 = scalar_lea.vmem %s1100_s28, 32 }
 0x1a3   : > { %v544_v41 = vsel %vm433_vm3, %v533_v35, 0.0  ;;  %p1102_p12 = scmp.lt.s32.totalorder %s614_s11, %s1100_s28  ;;  %p1103_p2 = scmp.lt.s32.totalorder %s1101_s16, %s1095_s10 }
 0x1a4   : > { %v539_v34 = vadd.f32 %v538_v32, %v537_v31  ;;  %v546_v43 = vsel %vm433_vm3, %v534_v38, 0.0  ;;  %p1097_p5 = pnand %p1096_p1, %p1710_p4 }
 0x1a5   : > { %p1104_p3 = por %p1103_p2, %p1102_p12 }
 0x1a6   : > { %v541_v37 = vadd.f32 %v540_v36, %v539_v34  ;;  %p1098_p11 = pneg %p1097_p5 }
 0x1a8   : > { %v543_v40 = vadd.f32 %v542_v39, %v541_v37  ;;  %p1105_p13 = pnand %p1104_p3, %p1098_p11 }
 0x1aa   : > { %v545_v42 = vadd.f32 %v544_v41, %v543_v40 }
 0x1ac   : > { %v547_v44 = vadd.f32 %v546_v43, %v545_v42 }
 0x1ae   : > { %v548_v45 = vrot.slane %v547_v44, 4 }
 0x1b0   : > { %v549_v46 = vadd.f32 %v548_v45, %v547_v44 }
 0x1b2   : > { %v550_v47 = vrot.slane %v549_v46, 2 }
 0x1b4   : > { %v551_v48 = vadd.f32 %v550_v47, %v549_v46 }
 0x1b6   : > { %v552_v49 = vrot.slane %v551_v48, 1 }
 0x1b8   : > { %v553_v50 = vadd.f32 %v552_v49, %v551_v48 }
 0x1ba   : > { %556 = vst.msk [vmem:[%s282_s29] sm:$0x1] %vm554_vm11, %v553_v50 }
 0x1bb   : > { %1108 = shalt.err (!%p1105_p13)
}
 0x1bc   : > { %s1109_s14 = scalar_lea.hbm %s1648_s9, 16  ;;  %s1113_s8 = scalar_lea.hbm %s1693_s4, 32 }
 0x1bd   : > { %p1110_p7 = scmp.ne.s32.totalorder %s1648_s9, %s1109_s14  ;;  %p1114_p9 = scmp.lt.u32.totalorder %s1648_s9, %s1693_s4 }
 0x1be   : > { %p1115_p10 = scmp.lt.u32.totalorder %s1113_s8, %s1109_s14  ;;  %p1117_p5 = scmp.lt.u32.totalorder %s1109_s14, %s1648_s9 }
 0x1bf   : > { %p1111_p6 = pnand %p1110_p7, %p1710_p4 }
 0x1c0   : > { %p1116_p1 = por %p1115_p10, %p1114_p9 }
 0x1c1   : > { %p1112_p8 = pneg %p1111_p6 }
 0x1c2   : > { %p1118_p11 = por %p1117_p5, %p1116_p1 }
 0x1c4   : > { %p1119_p12 = pnand %p1118_p11, %p1112_p8 }
 0x1c6   : > { %1122 = shalt.err (!%p1119_p12)
}
 0x1c7   : > { %885 = dma.vmem_to_hbm [thread:$0]  (%p1710_p4), %s614_s11, 16, %s1648_s9, %s1558_s15  }
 0x1c8 PF: > { %s638_s29 = sand.u32 1, %s1161_s18   ;;  %p1711_p2 = scmp.ne.s32.totalorder %s1702_s6, 0 }
 0x1c9   : > { %s639_s13 = scalar_lea.sflag [#allocation4], %s638_s29 }
 0x1ca   : > { %p896_p3 = pnand %p790_p0, %p1711_p2 }
 0x1cc   : > { %1148 = dma.done.wait (!%p896_p3), %s639_s13, 896  }
 0x1cd   : > { %1150 = vsyncadd (!%p896_p3), %s639_s13, 4294966400  ;;  %s647_s12 = sand.u32 1, %s787_s23  }
 0x1ce   : > { %s648_s10 = scalar_lea.sflag [#allocation9], %s647_s12 }
 0x1cf   : > { %1152 = dma.done.wait (!%p896_p3), %s648_s10, 32  }
 0x1d0   : > { %1154 = vsyncadd (!%p896_p3), %s648_s10, 4294967264  ;;  %s664_s30 = scalar_lea.sflag [#allocation12], %s638_s29 }
 0x1d1   : > { %1156 = dma.done.wait (!%p896_p3), %s664_s30, 16  }
 0x1d2   : > { %1158 = vsyncadd (!%p896_p3), %s664_s30, 4294967280  ;;  %p26_p4 = scmp.ge.s32.totalorder %s1245_s24, 4   ;;  %s1712_s18 = smov %s1165_s19 }
 0x1d3   : > { %s1713_s19 = smov %s1169_s20  ;;  %s1714_s20 = smov %s1257_s27 }
 0x1d4   : > { %s1715_s21 = smov %s1245_s24  ;;  %28 = sbr.rel (!%p26_p4) target bundleno = 10 (0xa), region = 126 }
 0x1db   :  { %668 = vsyncpa [#allocation3], 1 }
 0x1dc   :  { %670 = vsyncpa [#allocation3 + $0x1], 1 }
 0x1dd   :  { %671 = vsyncpa [#allocation6], 1 }
 0x1de   :  { %672 = vsyncpa [#allocation4], 1 }
 0x1df   :  { %674 = vsyncpa [#allocation4 + $0x1], 1 }
 0x1e0   :  { %675 = vsyncpa [#allocation9], 1 }
 0x1e1   :  { %677 = vsyncpa [#allocation9 + $0x1], 1 }
 0x1e2   :  { %678 = vsyncpa [#allocation12], 1 }
 0x1e3   :  { %680 = vsyncpa [#allocation12 + $0x1], 1 }

</bundles_post_ra>
